<compile_context>
chip_gen: v7x
topology: tpu7x:2x2x1
jax: 0.10.0
libtpu: 0.0.40
codegen_flags: <defaults>
</compile_context>

<pallas_src>
import functools

import jax
import jax.numpy as jnp
from jax.experimental import pallas as pl
from jax.experimental.pallas import tpu as pltpu


_MAX_TILE_M = 2048                      # hard cap on patch-rows per grid step (mult of 16)
_FALLBACK_VMEM_BYTES = 64 * 1024 * 1024  # conservative if hardware query fails


# ---------------------------------------------------------------------------
# Small helpers
# ---------------------------------------------------------------------------
def _round_up(x, m):
    return (x + m - 1) // m * m


def _cdiv(a, b):
    return (a + b - 1) // b


@functools.lru_cache(maxsize=1)
def _tpu_limits():
    """Returns (vmem_capacity_bytes, has_two_tensorcores)."""
    try:
        info = pltpu.get_tpu_info()
        vmem = int(getattr(info, "vmem_capacity_bytes", _FALLBACK_VMEM_BYTES))
    except Exception:  # off-TPU tracing / older runtimes
        vmem = _FALLBACK_VMEM_BYTES
    two_cores = vmem <= (96 * 1024 * 1024)  # v7x: 64 MiB VMEM per TC, 2 TCs per chip
    return vmem, two_cores


def _select_tile_m(m_rows, k, cout, n_corners, in_bytes, out_bytes, max_tile_m=None):
    """Pick TM (multiple of 16) from the real double-buffered VMEM footprint."""
    vmem, two_cores = _tpu_limits()
    cap = _MAX_TILE_M if max_tile_m is None else max(16, (max_tile_m // 16) * 16)
    per_row = (2 * n_corners * k * in_bytes   # patches tile, double-buffered
               + 2 * cout * out_bytes         # output tile, double-buffered
               + n_corners * cout * 4         # in-kernel f32 matmul accumulator
               + cout * 4)                    # pooled / activated f32 result
    budget = int(vmem * 0.4)                  # leave headroom for weights + compiler scratch
    tm = max(16, min(cap, (budget // per_row) // 16 * 16))
    if two_cores and m_rows > 512:
        # Guarantee >=2 grid steps so both v7x TensorCores get work.
        tm = min(tm, _round_up(_cdiv(m_rows, 2), 16))
    if m_rows <= tm:
        tm = _round_up(m_rows, 16)            # single full-extent block (tiny rounding pad)
    return tm


def _vmem_limit_bytes(tm, k, cout, n_corners, in_bytes, out_bytes):
    vmem, _ = _tpu_limits()
    footprint = (2 * n_corners * tm * k * in_bytes      # patches, double-buffered
                 + 2 * tm * cout * out_bytes            # output, double-buffered
                 + 2 * (k * cout * in_bytes + cout * 4)  # weights + bias
                 + n_corners * tm * cout * 4            # f32 accumulator
                 + tm * cout * 4)                       # epilogue result
    # Never request less than the 32 MiB default; never more than 3/4 of physical VMEM.
    return int(min(vmem * 3 // 4, max(32 << 20, footprint + (8 << 20))))


# ---------------------------------------------------------------------------
# Pallas kernels
# ---------------------------------------------------------------------------
def _conv_relu_kernel(p_ref, w_ref, b_ref, o_ref):
    # p_ref: (TM, K) im2col patches; w_ref: (K, Cout); b_ref: (1, Cout) f32.
    acc = jnp.dot(p_ref[...], w_ref[...], preferred_element_type=jnp.float32)
    acc = acc + b_ref[...].astype(jnp.float32)
    o_ref[...] = jnp.maximum(acc, 0.0).astype(o_ref.dtype)


def _conv_relu_pool_kernel(p_ref, w_ref, b_ref, o_ref):
    # p_ref: (4, TM, K) -- leading axis = the four 2x2 maxpool corners.
    # One long MXU pass (RHS staged once): (4*TM, K) @ (K, Cout), f32 accumulate,
    # then max over the corner axis. TM is a multiple of 16 so the (4,TM,K)->(4*TM,K)
    # and (4*TM,Cout)->(4,TM,Cout) reshapes are layout-free.
    four, tm, k = p_ref.shape
    acc = jnp.dot(p_ref[...].reshape(four * tm, k), w_ref[...],
                  preferred_element_type=jnp.float32)
    m = jnp.max(acc.reshape(four, tm, -1), axis=0)
    # relu(max_q(a_q) + b) == max_q(relu(a_q + b)): bias is shared, ReLU is monotone,
    # so bias/ReLU are applied once after the max (less VPU work).
    m = jnp.maximum(m + b_ref[...].astype(jnp.float32), 0.0)
    o_ref[...] = m.astype(o_ref.dtype)


# ---------------------------------------------------------------------------
# Wrapper glue (layout / im2col / tiling)
# ---------------------------------------------------------------------------
def _im2col(x_nhwc, kh, kw, stride, padding):
    """Returns patches (N, Ho, Wo, KH, KW, Cin), Ho, Wo."""
    N, H, W, Cin = x_nhwc.shape
    Ho = (H + 2 * padding - kh) // stride + 1
    Wo = (W + 2 * padding - kw) // stride + 1
    xp = jnp.pad(x_nhwc, ((0, 0), (padding, padding), (padding, padding), (0, 0)))
    if stride == kh and stride == kw:
        # Non-overlapping windows: single crop + reshape + transpose (no 9-slice stack).
        xc = xp[:, : kh * Ho, : kw * Wo, :]
        p = xc.reshape(N, Ho, kh, Wo, kw, Cin).transpose(0, 1, 3, 2, 4, 5)
    else:
        # General (overlapping) fallback.
        p = jnp.stack(
            [jnp.stack(
                [xp[:, i:i + stride * Ho:stride, j:j + stride * Wo:stride, :]
                 for j in range(kw)], axis=3)
             for i in range(kh)], axis=3)
    return p, Ho, Wo


def _weight_matrix(w_oihw, mxu_dtype):
    Cout, Cin, KH, KW = w_oihw.shape
    return jnp.transpose(w_oihw, (2, 3, 1, 0)).reshape(KH * KW * Cin, Cout).astype(mxu_dtype)


def conv2d_relu_pallas(x_nhwc, w_oihw, b, *, stride, padding, mxu_dtype,
                       out_dtype, max_tile_m=None):
    """Conv2d + ReLU via im2col + tiled Pallas MXU matmul. Returns (N, Ho, Wo, Cout)."""
    N, H, W, Cin = x_nhwc.shape
    Cout, Cin_w, KH, KW = w_oihw.shape
    assert Cin == Cin_w
    p, Ho, Wo = _im2col(x_nhwc, KH, KW, stride, padding)
    K = KH * KW * Cin
    M = N * Ho * Wo
    patches = p.reshape(M, K).astype(mxu_dtype)
    wm = _weight_matrix(w_oihw, mxu_dtype)
    bm = b.reshape(1, Cout).astype(jnp.float32)

    in_b = jnp.dtype(mxu_dtype).itemsize
    out_b = jnp.dtype(out_dtype).itemsize
    TM = _select_tile_m(M, K, Cout, 1, in_b, out_b, max_tile_m)
    if M <= TM:
        if TM != M:
            patches = jnp.pad(patches, ((0, TM - M), (0, 0)))  # tiny 16-row rounding pad
        grid_m, out_rows = 1, TM
    else:
        grid_m, out_rows = _cdiv(M, TM), M   # ragged last block masked by Pallas

    out = pl.pallas_call(
        _conv_relu_kernel,
        out_shape=jax.ShapeDtypeStruct((out_rows, Cout), out_dtype),
        grid=(grid_m,),
        in_specs=[
            pl.BlockSpec((TM, K), lambda i: (i, 0)),
            pl.BlockSpec((K, Cout), lambda i: (0, 0)),   # VMEM-resident across grid
            pl.BlockSpec((1, Cout), lambda i: (0, 0)),   # VMEM-resident across grid
        ],
        out_specs=pl.BlockSpec((TM, Cout), lambda i: (i, 0)),
        compiler_params=pltpu.CompilerParams(
            dimension_semantics=("parallel",),
            vmem_limit_bytes=_vmem_limit_bytes(TM, K, Cout, 1, in_b, out_b),
            allow_input_fusion=[True, False, False],     # fuse im2col into the call
        ),
        cost_estimate=pl.CostEstimate(
            flops=2 * M * K * Cout, transcendentals=0,
            bytes_accessed=M * K * in_b + K * Cout * in_b + Cout * 4 + M * Cout * out_b),
    )(patches, wm, bm)
    return out[:M].reshape(N, Ho, Wo, Cout)


def conv2d_relu_maxpool_pallas(x_nhwc, w_oihw, b, *, stride, padding, mxu_dtype,
                               out_dtype=jnp.float32, max_tile_m=None):
    """Fused Conv2d + ReLU + MaxPool2d(2,2) (floor mode). Returns (N, Hp, Wp, Cout)."""
    N, H, W, Cin = x_nhwc.shape
    Cout, Cin_w, KH, KW = w_oihw.shape
    assert Cin == Cin_w
    p, Ho, Wo = _im2col(x_nhwc, KH, KW, stride, padding)
    Hp, Wp = Ho // 2, Wo // 2
    K = KH * KW * Cin
    Mp = N * Hp * Wp

    # Reorder patch rows so the four 2x2 pool corners form a contiguous leading axis:
    # (N, Ho, Wo, KH, KW, C) -> (2, 2, N, Hp, Wp, KH, KW, C) -> (4, Mp, K).
    # Conv outputs dropped by floor-mode pooling are simply never computed.
    p = p[:, : 2 * Hp, : 2 * Wp]
    p = p.reshape(N, Hp, 2, Wp, 2, KH, KW, Cin).transpose(2, 4, 0, 1, 3, 5, 6, 7)
    patches = p.reshape(4, Mp, K).astype(mxu_dtype)
    wm = _weight_matrix(w_oihw, mxu_dtype)
    bm = b.reshape(1, Cout).astype(jnp.float32)

    in_b = jnp.dtype(mxu_dtype).itemsize
    out_b = jnp.dtype(out_dtype).itemsize
    TM = _select_tile_m(Mp, K, Cout, 4, in_b, out_b, max_tile_m)
    if Mp <= TM:
        if TM != Mp:
            patches = jnp.pad(patches, ((0, 0), (0, TM - Mp), (0, 0)))
        grid_m, out_rows = 1, TM
    else:
        grid_m, out_rows = _cdiv(Mp, TM), Mp   # ragged last block masked by Pallas

    out = pl.pallas_call(
        _conv_relu_pool_kernel,
        out_shape=jax.ShapeDtypeStruct((out_rows, Cout), out_dtype),
        grid=(grid_m,),
        in_specs=[
            pl.BlockSpec((4, TM, K), lambda i: (0, i, 0)),
            pl.BlockSpec((K, Cout), lambda i: (0, 0)),   # VMEM-resident across grid
            pl.BlockSpec((1, Cout), lambda i: (0, 0)),   # VMEM-resident across grid
        ],
        out_specs=pl.BlockSpec((TM, Cout), lambda i: (i, 0)),
        compiler_params=pltpu.CompilerParams(
            dimension_semantics=("parallel",),
            vmem_limit_bytes=_vmem_limit_bytes(TM, K, Cout, 4, in_b, out_b),
            allow_input_fusion=[True, False, False],     # fuse corner-reorder/im2col in
        ),
        cost_estimate=pl.CostEstimate(
            flops=2 * 4 * Mp * K * Cout, transcendentals=0,
            bytes_accessed=4 * Mp * K * in_b + K * Cout * in_b + Cout * 4 + Mp * Cout * out_b),
    )(patches, wm, bm)
    return out[:Mp].reshape(N, Hp, Wp, Cout)


# ---------------------------------------------------------------------------
# ConvBlock forward
# ---------------------------------------------------------------------------
def init_conv_block_params(key, num_layers=1, in_channels=4, out_channels=128,
                           conv_kernel_size=3):
    """Deterministic synthetic parameter init (matches nn.Conv2d shapes)."""
    params = []
    for i in range(num_layers):
        cin = in_channels if i == 0 else out_channels
        key, kw, kb = jax.random.split(key, 3)
        fan_in = cin * conv_kernel_size * conv_kernel_size
        bound = 1.0 / (fan_in ** 0.5)
        w = jax.random.uniform(kw, (out_channels, cin, conv_kernel_size, conv_kernel_size),
                               jnp.float32, -bound, bound)
        b = jax.random.uniform(kb, (out_channels,), jnp.float32, -bound, bound)
        params.append((w, b))
    return params


@functools.partial(jax.jit,
                   static_argnames=("stride_conv", "padding", "use_bf16_mxu", "max_tile_m"))
def conv_block_forward(x_nchw, params, stride_conv=3, padding=1, use_bf16_mxu=True,
                       max_tile_m=None):
    """ConvBlock.forward: num_layers x (conv + ReLU), then 2x2 maxpool. NCHW in/out.

    The final conv layer is fused with the maxpool into one Pallas kernel, so the
    default num_layers=1 configuration is a single pallas_call for the whole block.
    Intermediate layer activations are kept in the MXU dtype (bf16 by default) to
    halve HBM traffic; the final output is always f32 before the dtype cast back.
    """
    mxu_dtype = jnp.bfloat16 if use_bf16_mxu else jnp.float32
    x = jnp.transpose(x_nchw, (0, 2, 3, 1)).astype(jnp.float32)  # NCHW -> NHWC
    n_layers = len(params)
    for i, (w, b) in enumerate(params):
        if i == n_layers - 1:
            x = conv2d_relu_maxpool_pallas(x, w, b, stride=stride_conv, padding=padding,
                                           mxu_dtype=mxu_dtype, out_dtype=jnp.float32,
                                           max_tile_m=max_tile_m)
        else:
            x = conv2d_relu_pallas(x, w, b, stride=stride_conv, padding=padding,
                                   mxu_dtype=mxu_dtype, out_dtype=mxu_dtype,
                                   max_tile_m=max_tile_m)
    return jnp.transpose(x, (0, 3, 1, 2)).astype(x_nchw.dtype)  # NHWC -> NCHW


# ---------------------------------------------------------------------------
# Pure-XLA reference
# ---------------------------------------------------------------------------
def _reference_forward(x_nchw, params, stride_conv=3, padding=1):
    x = x_nchw
    for (w, b) in params:
        x = jax.lax.conv_general_dilated(
            x, w, window_strides=(stride_conv, stride_conv),
            padding=((padding, padding), (padding, padding)),
            dimension_numbers=("NCHW", "OIHW", "NCHW"))
        x = jnp.maximum(x + b[None, :, None, None], 0.0)
    x = jax.lax.reduce_window(x, -jnp.inf, jax.lax.max,
                              window_dimensions=(1, 1, 2, 2),
                              window_strides=(1, 1, 2, 2), padding="VALID")
    return x


if __name__ == "__main__":
    key = jax.random.PRNGKey(0)
    kx, kp = jax.random.split(key)

    # Module-consistent small shapes: batch=2, in_channels=4, 16x16, out_channels=128.
    N, Cin, H, W = 2, 4, 16, 16
    x = jax.random.normal(kx, (N, Cin, H, W), jnp.float32)
    params1 = init_conv_block_params(kp, num_layers=1, in_channels=Cin,
                                     out_channels=128, conv_kernel_size=3)
    ref = _reference_forward(x, params1)

    # 1) f32 MXU path: tight numerical check of the fused conv+ReLU+maxpool kernel.
    out_f32 = conv_block_forward(x, params1, use_bf16_mxu=False)
    jax.block_until_ready(out_f32)
    assert out_f32.shape == ref.shape == (2, 128, 3, 3), (out_f32.shape, ref.shape)
    assert jnp.allclose(out_f32, ref, atol=1e-4, rtol=1e-4), "f32 path mismatch"

    # 2) bf16 MXU path (perf default; f32 accumulate) — bf16-level tolerance.
    out_bf16 = conv_block_forward(x, params1, use_bf16_mxu=True)
    jax.block_until_ready(out_bf16)
    assert jnp.allclose(out_bf16, ref, atol=5e-2, rtol=5e-2), "bf16 path mismatch"

    # 3) Larger spatial input: once with auto (big-tile) selection, once with a forced
    #    small tile so the multi-step parallel grid path is exercised (512 rows / 256).
    x_big = jax.random.normal(kx, (2, Cin, 96, 96), jnp.float32)
    ref_big = _reference_forward(x_big, params1)
    out_big = conv_block_forward(x_big, params1, use_bf16_mxu=True)
    out_big_tiled = conv_block_forward(x_big, params1, use_bf16_mxu=True, max_tile_m=256)
    jax.block_until_ready((out_big, out_big_tiled))
    assert out_big.shape == ref_big.shape == (2, 128, 16, 16), (out_big.shape, ref_big.shape)
    assert jnp.allclose(out_big, ref_big, atol=5e-2, rtol=5e-2), "big bf16 path mismatch"
    assert jnp.allclose(out_big_tiled, ref_big, atol=5e-2, rtol=5e-2), "tiled bf16 path mismatch"

    # 4) num_layers=2 -> plain conv+ReLU kernel (bf16 intermediate) followed by the
    #    fused kernel with K=1152; f32 path checked tightly, bf16 loosely.
    params2 = init_conv_block_params(kp, num_layers=2, in_channels=Cin,
                                     out_channels=128, conv_kernel_size=3)
    ref_2l = _reference_forward(x, params2)
    out_2l_f32 = conv_block_forward(x, params2, use_bf16_mxu=False)
    out_2l_bf16 = conv_block_forward(x, params2, use_bf16_mxu=True)
    jax.block_until_ready((out_2l_f32, out_2l_bf16))
    assert out_2l_f32.shape == ref_2l.shape == (2, 128, 1, 1), (out_2l_f32.shape, ref_2l.shape)
    assert jnp.allclose(out_2l_f32, ref_2l, atol=1e-3, rtol=1e-3), "2-layer f32 path mismatch"
    assert jnp.allclose(out_2l_bf16, ref_2l, atol=1e-1, rtol=1e-1), "2-layer bf16 path mismatch"

    print("KERNEL_OK")
</pallas_src>

<mosaic_0001>
module attributes {stable_mosaic.version = 11 : i64} {
  func.func @_conv_relu_pool_kernel(%arg0: i32, %arg1: memref<4x32x36xf32, #tpu.memory_space<vmem>>, %arg2: memref<36x128xf32, #tpu.memory_space<vmem>>, %arg3: memref<1x128xf32, #tpu.memory_space<vmem>>, %arg4: memref<32x128xf32, #tpu.memory_space<vmem>>) attributes {dimension_semantics = [#tpu.dimension_semantics<parallel>], iteration_bounds = array<i64: 1>, scalar_prefetch = 0 : i64, scratch_operands = 0 : i64, tpu.core_type = #tpu.core_type<tc>, window_params = [{transform_indices = @transform_0, window_bounds = array<i64: 4, 32, 36>}, {pipeline_mode = #tpu.pipeline_mode<synchronous>, transform_indices = @transform_1, window_bounds = array<i64: 36, 128>}, {pipeline_mode = #tpu.pipeline_mode<synchronous>, transform_indices = @transform_2, window_bounds = array<i64: 1, 128>}, {transform_indices = @transform_3, window_bounds = array<i64: 32, 128>}]} {
    %c0 = arith.constant 0 : index
    %c0_0 = arith.constant 0 : index
    %c0_1 = arith.constant 0 : index
    %0 = vector.load %arg1[%c0, %c0_0, %c0_1] : memref<4x32x36xf32, #tpu.memory_space<vmem>>, vector<4x32x36xf32>
    %1 = vector.shape_cast %0 : vector<4x32x36xf32> to vector<128x36xf32>
    %c0_2 = arith.constant 0 : index
    %c0_3 = arith.constant 0 : index
    %2 = vector.load %arg2[%c0_2, %c0_3] : memref<36x128xf32, #tpu.memory_space<vmem>>, vector<36x128xf32>
    %cst = arith.constant dense<0.000000e+00> : vector<128x128xf32>
    %3 = tpu.matmul %1, %2, %cst {dimension_numbers = #tpu.dot_dimension_numbers<[1], [0], [0], [1], [0, 0, 1, 1], [], []>} : vector<128x36xf32>, vector<36x128xf32>, vector<128x128xf32> -> vector<128x128xf32>
    %4 = vector.shape_cast %3 : vector<128x128xf32> to vector<4x32x128xf32>
    %cst_4 = arith.constant dense<0xFF800000> : vector<32x128xf32>
    %5 = vector.multi_reduction <maximumf>, %4, %cst_4 [0] : vector<4x32x128xf32> to vector<32x128xf32>
    %c0_5 = arith.constant 0 : index
    %c0_6 = arith.constant 0 : index
    %6 = vector.load %arg3[%c0_5, %c0_6] : memref<1x128xf32, #tpu.memory_space<vmem>>, vector<1x128xf32>
    %7 = vector.broadcast %6 : vector<1x128xf32> to vector<32x128xf32>
    %8 = arith.addf %5, %7 : vector<32x128xf32>
    %cst_7 = arith.constant 0.000000e+00 : f32
    %9 = vector.broadcast %cst_7 : f32 to vector<32x128xf32>
    %10 = arith.maximumf %8, %9 : vector<32x128xf32>
    %c0_8 = arith.constant 0 : index
    %c0_9 = arith.constant 0 : index
    %11 = vector.load %arg4[%c0_8, %c0_9] : memref<32x128xf32, #tpu.memory_space<vmem>>, vector<32x128xf32>
    tpu.vector_store %arg4[%c0_8, %c0_9], %10 {strides = array<i32>} : memref<32x128xf32, #tpu.memory_space<vmem>>, vector<32x128xf32>,
    return
  }
  func.func @transform_0(%arg0: i32) -> (i32, i32, i32) {
    %c0_i32 = arith.constant 0 : i32
    %c0_i32_0 = arith.constant 0 : i32
    %c0_i32_1 = arith.constant 0 : i32
    return %c0_i32, %arg0, %c0_i32_0 : i32, i32, i32
  }
  func.func @transform_1(%arg0: i32) -> (i32, i32) {
    %c0_i32 = arith.constant 0 : i32
    %c0_i32_0 = arith.constant 0 : i32
    %c0_i32_1 = arith.constant 0 : i32
    return %c0_i32, %c0_i32_0 : i32, i32
  }
  func.func @transform_2(%arg0: i32) -> (i32, i32) {
    %c0_i32 = arith.constant 0 : i32
    %c0_i32_0 = arith.constant 0 : i32
    %c0_i32_1 = arith.constant 0 : i32
    return %c0_i32, %c0_i32_0 : i32, i32
  }
  func.func @transform_3(%arg0: i32) -> (i32, i32) {
    %c0_i32 = arith.constant 0 : i32
    %c0_i32_0 = arith.constant 0 : i32
    return %arg0, %c0_i32 : i32, i32
  }
}

</mosaic_0001>

<bundles_post_ra>
// kernel: conv_block_forward.2
= control target key start
LH: loop header
LB: loop body
LE: loop exit
PB: predicated region body
PF: predicated region fallthrough
CT: control target
= control target key end

     0   :  { %v22_v4 = vlaneseq  ;;  %vm227_vm0 = vcmask 293888   ;;  %vm276_vm2 = vcmask 1043456   ;;  %s710_s0 = inlined_call_operand.vmem [shape: f32[36,128], index: 0, kind: input, shape index: {}]   ;;  %s711_s1 = inlined_call_operand.vmem [shape: f32[1,128], index: 1, kind: input, shape index: {}]   ;;  %s712_s2 = inlined_call_operand.vmem [shape: f32[4,18,36], index: 2, kind: input, shape index: {}]   ;;  %s713_s3 = inlined_call_operand.<no memory space> [shape: f32[], index: 3, kind: input, shape index: {}]   ;;  %s714_s4 = inlined_call_operand.vmem [shape: f32[32,128], index: 4, kind: output, shape index: {}]  }
   0x1   :  { %v586_v0 = vstv %s713_s3  ;;  %v222_v1 = vld [vmem:[%s710_s0] sm:$0xff]  ;;  %v223_v2 = vld [vmem:[%s710_s0 + $0x8] sm:$0xff]  ;;  %v224_v3 = vld [vmem:[%s710_s0 + $0x10] sm:$0xff] }
   0x2   :  { %v544_v5 = vpack.c.bf16 %v223_v2, %v222_v1  ;;  %v225_v6 = vld [vmem:[%s710_s0 + $0x18] sm:$0xff]  ;;  %v16_v8 = vld [vmem:[%s712_s2] sm:$0xff]  ;;  %v23_v9 = vand.u32 127, %v22_v4  ;;  %v465_v10 = vld [vmem:[%s712_s2 + $0x30] sm:$0xff]  ;;  %v47_v11 = vshrl.u32 %v22_v4, 7 }
   0x3   :  { %v548_v7 = vpack.c.bf16 %v225_v6, %v224_v3  ;;  %v461_v15 = vld [vmem:[%s712_s2 + $0x10] sm:$0xff]  ;;  %v467_v16 = vld [vmem:[%s712_s2 + $0x40] sm:$0xff]  ;;  %v460_v18 = vld [vmem:[%s712_s2 + $0x8] sm:$0xff] }
   0x4   :  { %545 = vmatprep.subr.bf16.mxu0 %v544_v5  ;;  %552 = vmatprep.subr.bf16.mxu1 %v544_v5  ;;  %vm25_vm1 = vcmp.lt.s32.totalorder %v23_v9, 36  ;;  %v48_v12 = vadd.s32 16, %v47_v11  ;;  %v226_v17 = vld [vmem:[%s710_s0 + $0x20] sm:$0xf]  ;;  %v466_v19 = vld [vmem:[%s712_s2 + $0x38] sm:$0xff]  ;;  %v468_v27 = vld [vmem:[%s712_s2 + $0x48] sm:$0xff] }
   0x5   :  { %547 = vmatpush3.bf16.msra.mxu0 %v544_v5  ;;  %555 = vmatpush3.bf16.msra.mxu1 %v544_v5  ;;  %v26_v13 = vsel %vm25_vm1, %v16_v8, %v586_v0  ;;  %v121_v14 = vsel %vm25_vm1, %v465_v10, %v586_v0  ;;  %v40_v22 = vsel %vm25_vm1, %v460_v18, %v586_v0  ;;  %v462_v26 = vld [vmem:[%s712_s2 + $0x18] sm:$0xff]  ;;  %v464_v28 = vld [vmem:[%s712_s2 + $0x28] sm:$0xff]  ;;  %v463_v31 = vld [vmem:[%s712_s2 + $0x20] sm:$0xff] }
   0x6   :  { %549 = vmatprep.subr.bf16.mxu0 %v548_v7  ;;  %553 = vmatprep.subr.bf16.mxu1 %v548_v7  ;;  %vm49_vm3 = vcmp.lt.s32.totalorder %v48_v12, 18  ;;  %v136_v23 = vsel %vm25_vm1, %v466_v19, %v586_v0  ;;  %v470_v29 = vld [vmem:[%s712_s2 + $0x58] sm:$0xff]  ;;  %v73_v30 = vsel %vm25_vm1, %v462_v26, %v586_v0  ;;  %v169_v32 = vsel %vm25_vm1, %v468_v27, %v586_v0  ;;  %v469_v33 = vld [vmem:[%s712_s2 + $0x50] sm:$0xff]  ;;  %v488_v55 = vld [vmem:[%s711_s1] ss:$0 sm:$0xff] }
   0x7   :  { %520 = vmatprep.mubr.msk.f32.mxu0 %vm227_vm0, %v26_v13  ;;  %532 = vmatprep.mubr.msk.f32.mxu1 %vm227_vm0, %v121_v14  ;;  %v50_v20 = vsel %vm49_vm3, %v461_v15, %v586_v0  ;;  %v146_v21 = vsel %vm49_vm3, %v467_v16, %v586_v0  ;;  %v98_v34 = vsel %vm49_vm3, %v464_v28, %v586_v0 }
   0x8   :  { %v55_v24 = vsel %vm25_vm1, %v50_v20, %v586_v0  ;;  %v151_v25 = vsel %vm25_vm1, %v146_v21, %v586_v0  ;;  %v194_v35 = vsel %vm49_vm3, %v470_v29, %v586_v0  ;;  %v88_v36 = vsel %vm25_vm1, %v463_v31, %v586_v0 }
   0x9   :  { %551 = vmatpush3.bf16.msra.mxu0 %v548_v7  ;;  %556 = vmatpush3.bf16.msra.mxu1 %v548_v7  ;;  %v184_v37 = vsel %vm25_vm1, %v469_v33, %v586_v0  ;;  %v103_v38 = vsel %vm25_vm1, %v98_v34, %v586_v0  ;;  %v199_v39 = vsel %vm25_vm1, %v194_v35, %v586_v0 }
   0xa   :  { %518 = vmatprep.subr.msk.mxu0 %vm276_vm2, %v226_v17  ;;  %554 = vmatprep.subr.msk.mxu1 %vm276_vm2, %v226_v17 }
   0xd   :  { %519 = vmatpush3.msk.msra.mxu0 %vm276_vm2, %v226_v17  ;;  %557 = vmatpush3.msk.msra.mxu1 %vm276_vm2, %v226_v17 }
   0xe   :  { %521 = vmatmul.mubr.msk.f32.vlgmr.msra.gmra.mrb[0].mxu0 %vm227_vm0, %v40_v22  ;;  %533 = vmatmul.mubr.msk.f32.vlgmr.msra.gmra.mrb[0].mxu1 %vm227_vm0, %v136_v23 }
   0xf   :  { %523 = vmatprep.mubr.msk.f32.mxu0 %vm227_vm0, %v55_v24  ;;  %535 = vmatprep.mubr.msk.f32.mxu1 %vm227_vm0, %v151_v25 }
  0x12   :  { %524 = vmatmul.mubr.msk.f32.gmra.mrb[2].mxu0 %vm227_vm0, %v586_v0  ;;  %536 = vmatmul.mubr.msk.f32.gmra.mrb[2].mxu1 %vm227_vm0, %v586_v0 }
  0x13   :  { %526 = vmatprep.mubr.msk.f32.mxu0 %vm227_vm0, %v73_v30  ;;  %538 = vmatprep.mubr.msk.f32.mxu1 %vm227_vm0, %v169_v32 }
  0x16   :  { %527 = vmatmul.mubr.msk.f32.gmra.mrb[4].mxu0 %vm227_vm0, %v88_v36  ;;  %539 = vmatmul.mubr.msk.f32.gmra.mrb[4].mxu1 %vm227_vm0, %v184_v37 }
  0x17   :  { %529 = vmatprep.mubr.msk.f32.mxu0 %vm227_vm0, %v103_v38  ;;  %541 = vmatprep.mubr.msk.f32.mxu1 %vm227_vm0, %v199_v39 }
  0x1a   :  { %530 = vmatmul.mubr.msk.f32.gmra.mrb[6].mxu0 %vm227_vm0, %v586_v0  ;;  %542 = vmatmul.mubr.msk.f32.gmra.mrb[6].mxu1 %vm227_vm0, %v586_v0 }
  0xe1   :  { %v522_v40 = vpop.f32.mrb[0].mxu0  ;;  %v534_v41 = vpop.f32.mrb[0].mxu1 }
  0xe2   :  { %v346_v42 = vpop.f32.mrb[1].mxu0  ;;  %v386_v43 = vpop.f32.mrb[1].mxu1 }
  0xe5   :  { %v525_v44 = vpop.f32.mrb[2].mxu0  ;;  %v537_v45 = vpop.f32.mrb[2].mxu1 }
  0xe6   :  { %v356_v46 = vpop.f32.mrb[3].mxu0  ;;  %v396_v47 = vpop.f32.mrb[3].mxu1 }
  0xe9   :  { %v528_v48 = vpop.f32.mrb[4].mxu0  ;;  %v540_v49 = vpop.f32.mrb[4].mxu1 }
  0xea   :  { %v428_v50 = vmax.f32 %v522_v40, %v528_v48  ;;  %v366_v51 = vpop.f32.mrb[5].mxu0  ;;  %v406_v52 = vpop.f32.mrb[5].mxu1 }
  0xeb   :  { %v425_v53 = vmax.f32 %v346_v42, %v366_v51 }
  0xec   :  { %v429_v54 = vmax.f32 %v428_v50, %v534_v41 }
  0xed   :  { %v531_v56 = vpop.f32.mrb[6].mxu0  ;;  %v426_v57 = vmax.f32 %v425_v53, %v386_v43  ;;  %v543_v58 = vpop.f32.mrb[6].mxu1 }
  0xee   :  { %v430_v59 = vmax.f32 %v429_v54, %v540_v49  ;;  %v434_v60 = vmax.f32 %v525_v44, %v531_v56  ;;  %v376_v61 = vpop.f32.mrb[7].mxu0  ;;  %v416_v62 = vpop.f32.mrb[7].mxu1 }
  0xef   :  { %v427_v63 = vmax.f32 %v426_v57, %v406_v52  ;;  %v431_v0 = vmax.f32 %v356_v46, %v376_v61 }
  0xf0   :  { %v445_v1 = vadd.f32 %v488_v55, %v430_v59  ;;  %v435_v2 = vmax.f32 %v434_v60, %v537_v45 }
  0xf1   :  { %v444_v3 = vadd.f32 %v488_v55, %v427_v63  ;;  %v432_v4 = vmax.f32 %v431_v0, %v396_v47 }
  0xf2   :  { %v449_v5 = vmax.f32 %v445_v1, 0.0  ;;  %v436_v6 = vmax.f32 %v435_v2, %v543_v58 }
  0xf3   :  { %v448_v7 = vmax.f32 %v444_v3, 0.0  ;;  %v433_v8 = vmax.f32 %v432_v4, %v416_v62 }
  0xf4   :  { %453 = vst [vmem:[%s714_s4 + $0x8] sm:$0xff] %v449_v5  ;;  %v447_v9 = vadd.f32 %v488_v55, %v436_v6 }
  0xf5   :  { %452 = vst [vmem:[%s714_s4] sm:$0xff] %v448_v7  ;;  %v446_v10 = vadd.f32 %v488_v55, %v433_v8 }
  0xf6   :  { %v451_v11 = vmax.f32 %v447_v9, 0.0 }
  0xf7   :  { %v450_v12 = vmax.f32 %v446_v10, 0.0 }
  0xf8   :  { %455 = vst [vmem:[%s714_s4 + $0x18] sm:$0xff] %v451_v11 }
  0xf9   :  { %454 = vst [vmem:[%s714_s4 + $0x10] sm:$0xff] %v450_v12 }

</bundles_post_ra>
